<compile_context>
chip_gen: v5e
topology: v5e:2x2
jax: 0.10.0
libtpu: 0.0.40
codegen_flags: <defaults>
</compile_context>

<pallas_src>
import math

import jax
import jax.numpy as jnp
from jax.experimental import pallas as pl
from jax.experimental.pallas import tpu as pltpu

# ----------------------------------------------------------------------------
# Loihi neuron constants (float approximation of Loihi fixed-point CUBA model)
# ----------------------------------------------------------------------------
WGT_SCALE = 64.0                      # 2**6 weight mapping on Loihi
I_DECAY = 1024                        # current decay (0..4096)
V_DECAY = 128                         # voltage decay (0..4096)
THETA = 80                            # firing threshold (pre 2**6 scaling)
I_KEEP = (4096.0 - I_DECAY) / 4096.0
V_KEEP = (4096.0 - V_DECAY) / 4096.0
THETA_SCALED = THETA * WGT_SCALE
# TODO(synk): the float CUBA model approximates Loihi's fixed-point
# (x*(4096-decay))>>12 arithmetic; spikes can differ near threshold from the
# integer reference.


# ----------------------------------------------------------------------------
# Fused Pallas kernel: one merged conv matmul -> CUBA scan -> delayShift(1)
# ----------------------------------------------------------------------------
def _fused_conv_loihi_kernel(p_ref, w_ref, o_ref):
    """p_ref: (K, T*M) bf16 im2col patches, T-major in the lane dim,
       w_ref: (Cout, K) bf16 conv weights with WGT_SCALE pre-folded,
       o_ref: (T, Cout, M) bf16 output spikes (already delay-shifted by 1)."""
    T, Cout, M = o_ref.shape

    # One MXU matmul for ALL time steps: (Cout, K) @ (K, T*M), f32 accumulate.
    # At this size the result (8, 2048) f32 is only 16 vregs.
    wt_all = jnp.dot(w_ref[...], p_ref[...], preferred_element_type=jnp.float32)

    # delayShift(1): output[0] = 0, output[t+1] = spike[t]; spike[T-1] is discarded
    # (so it is never computed below).
    o_ref[0] = jnp.zeros((Cout, M), o_ref.dtype)

    u = jnp.zeros((Cout, M), jnp.float32)
    v = jnp.zeros((Cout, M), jnp.float32)
    # Short fixed trip count (T-1): fully unrolled straight-line scan.  Every slice
    # of wt_all is a static 128-lane-aligned column window -> zero-cost vreg view.
    for t in range(T - 1):
        wt = wt_all[:, t * M:(t + 1) * M]
        # Loihi CUBA dynamics (WGT_SCALE already folded into the weights):
        #   u[t] = u[t-1]*(1 - iDecay/4096) + 2^6 * conv(spike)[t]
        #   v[t] = v[t-1]*(1 - vDecay/4096) + u[t]
        #   spike = v >= theta*2^6 ; v reset to 0 on spike
        u = u * I_KEEP + wt
        v = v * V_KEEP + u
        fired = v >= THETA_SCALED
        v = jnp.where(fired, 0.0, v)
        o_ref[t + 1] = fired.astype(jnp.float32).astype(o_ref.dtype)


def fused_conv_loihi(patches_ktm, w_cm, T, M):
    """patches_ktm: (K, T*M) bf16, w_cm: (Cout, K) bf16 -> (T, Cout, M) bf16 spikes."""
    K, TM = patches_ktm.shape
    Cout = w_cm.shape[0]
    assert TM == T * M
    # Single grid step: the whole problem (~250 KiB) fits in VMEM on every generation.
    # TODO(synk): at production H/W/C/T sizes, make M = N*Hout*Wout a leading
    # "parallel" grid axis (>=256-512 lanes per block) to use both v7x TensorCores,
    # pipeline T via BlockSpecs instead of one resident slab, and re-derive the VMEM
    # budget against v7x's 64 MiB (set vmem_limit_bytes explicitly).
    return pl.pallas_call(
        _fused_conv_loihi_kernel,
        out_shape=jax.ShapeDtypeStruct((T, Cout, M), jnp.bfloat16),
        grid_spec=pltpu.PrefetchScalarGridSpec(
            num_scalar_prefetch=0,
            grid=(1,),
            in_specs=[
                pl.BlockSpec((K, TM), lambda i: (0, 0)),
                pl.BlockSpec((Cout, K), lambda i: (0, 0)),
            ],
            out_specs=pl.BlockSpec((T, Cout, M), lambda i: (0, 0, 0)),
        ),
        compiler_params=pltpu.CompilerParams(
            dimension_semantics=("arbitrary",),
        ),
    )(patches_ktm, w_cm)


# ----------------------------------------------------------------------------
# Glue: im2col laid out directly as (K, T*M) so the kernel needs no transposes
# and the merged (Cout,K)@(K,T*M) matmul reads it as-is.
# ----------------------------------------------------------------------------
def im2col_ktm(x, kH, kW, stride, padding):
    """x: (N, Cin, H, W, T) -> patches (Cin*kH*kW, T*N*Hout*Wout), Hout, Wout."""
    N, Cin, H, W, T = x.shape
    xp = jnp.pad(x, ((0, 0), (0, 0), (padding, padding), (padding, padding), (0, 0)))
    Hout = (H + 2 * padding - kH) // stride + 1
    Wout = (W + 2 * padding - kW) // stride + 1
    cols = []
    for i in range(kH):
        for j in range(kW):
            cols.append(xp[:, :, i:i + stride * Hout:stride,
                           j:j + stride * Wout:stride, :])   # (N, Cin, Hout, Wout, T)
    col = jnp.stack(cols, axis=2)                 # (N, Cin, kH*kW, Hout, Wout, T)
    # K ordering (Cin, kH, kW) matches weight.reshape(Cout, Cin*kH*kW).
    col = col.transpose(1, 2, 5, 0, 3, 4)         # (Cin, kH*kW, T, N, Hout, Wout)
    col = col.reshape(Cin * kH * kW, T * N * Hout * Wout)    # (K, T*M), T-major lanes
    return col, Hout, Wout
    # TODO(synk): at production sizes move this gather in-kernel (kH*kW accumulated
    # matmuls over shifted slices of the padded input) to avoid the ~9x HBM patch
    # expansion and the K=36 sublane padding; negligible at this toy size.


def conv_block_forward(spike, weight, stride=1, padding=1):
    """convBlock.forward: conv -> spikeLoihi -> delayShift(1).  spike: (N,Cin,H,W,T)."""
    N, Cin, H, W, T = spike.shape
    Cout, _, kH, kW = weight.shape

    patches, Hout, Wout = im2col_ktm(spike, kH, kW, stride, padding)
    M = N * Hout * Wout

    # bf16 is exact for {0,1} spikes; WGT_SCALE is folded into the (even-integer,
    # |w|<=16 here) quantized weights, still exact in bf16 (checked in __main__).
    patches = patches.astype(jnp.bfloat16)                              # (K, T*M)
    w_cm = (weight.reshape(Cout, Cin * kH * kW) * WGT_SCALE).astype(jnp.bfloat16)

    spikes = fused_conv_loihi(patches, w_cm, T, M)        # (T, Cout, N*Hout*Wout) bf16

    # Back to the PyTorch/SLAYER layout (N, Cout, Hout, Wout, T); cast back to f32
    # to match the reference module's output dtype (values are exactly {0,1}).
    spikes = spikes.reshape(T, Cout, N, Hout, Wout).transpose(2, 1, 3, 4, 0)
    return spikes.astype(jnp.float32)


if __name__ == "__main__":
    # Module-equivalent config: convBlock(slayer, inChannels=4, outChannels=8,
    #                                     kernelSize=3, padding=1)
    N, Cin, Cout = 2, 4, 8
    H = W = 8
    T = 16
    kH = kW = 3
    stride, padding = 1, 1
    weight_scale = 100.0

    key = jax.random.PRNGKey(0)
    k_w, k_x = jax.random.split(key)

    # deterministic conv weight init (~ PyTorch uniform bound), then weightScale,
    # then preHookFx = quantize(step=2)
    fan_in = Cin * kH * kW
    bound = 1.0 / math.sqrt(fan_in)
    weight = jax.random.uniform(k_w, (Cout, Cin, kH, kW),
                                minval=-bound, maxval=bound, dtype=jnp.float32)
    weight = weight * weight_scale
    weight = jnp.round(weight / 2.0) * 2.0          # utils.quantize(x, step=2)

    # Safety check (per review): the WGT_SCALE-folded quantized weights must be
    # exactly representable in bf16, otherwise the cast would silently round.
    w_scaled = weight * WGT_SCALE
    roundtrip = w_scaled.astype(jnp.bfloat16).astype(jnp.float32)
    assert float(jnp.max(jnp.abs(roundtrip - w_scaled))) == 0.0, \
        "quantized weights * WGT_SCALE not exact in bf16"

    # binary input spike train (N, Cin, H, W, T)
    spike_in = jax.random.bernoulli(k_x, 0.3, (N, Cin, H, W, T)).astype(jnp.float32)

    fwd = jax.jit(conv_block_forward, static_argnames=("stride", "padding"))
    out = fwd(spike_in, weight, stride=stride, padding=padding)
    out = jax.block_until_ready(out)
    assert out.shape == (N, Cout, H, W, T), out.shape
    print("KERNEL_OK")
</pallas_src>

<mosaic_0001>
module attributes {stable_mosaic.version = 11 : i64} {
  func.func @_fused_conv_loihi_kernel(%arg0: i32, %arg1: memref<36x2048xbf16, #tpu.memory_space<vmem>>, %arg2: memref<8x36xbf16, #tpu.memory_space<vmem>>, %arg3: memref<16x8x128xbf16, #tpu.memory_space<vmem>>) attributes {dimension_semantics = [#tpu.dimension_semantics<arbitrary>], iteration_bounds = array<i64: 1>, scalar_prefetch = 0 : i64, scratch_operands = 0 : i64, tpu.core_type = #tpu.core_type<tc>, window_params = [{pipeline_mode = #tpu.pipeline_mode<synchronous>, transform_indices = @transform_0, window_bounds = array<i64: 36, 2048>}, {pipeline_mode = #tpu.pipeline_mode<synchronous>, transform_indices = @transform_1, window_bounds = array<i64: 8, 36>}, {pipeline_mode = #tpu.pipeline_mode<synchronous>, transform_indices = @transform_2, window_bounds = array<i64: 16, 8, 128>}]} {
    %c0 = arith.constant 0 : index
    %c0_0 = arith.constant 0 : index
    %0 = vector.load %arg2[%c0, %c0_0] : memref<8x36xbf16, #tpu.memory_space<vmem>>, vector<8x36xbf16>
    %c0_1 = arith.constant 0 : index
    %c0_2 = arith.constant 0 : index
    %1 = vector.load %arg1[%c0_1, %c0_2] : memref<36x2048xbf16, #tpu.memory_space<vmem>>, vector<36x2048xbf16>
    %cst = arith.constant dense<0.000000e+00> : vector<8x2048xf32>
    %2 = tpu.matmul %0, %1, %cst {dimension_numbers = #tpu.dot_dimension_numbers<[1], [0], [0], [1], [0, 0, 1, 1], [], []>} : vector<8x36xbf16>, vector<36x2048xbf16>, vector<8x2048xf32> -> vector<8x2048xf32>
    %cst_3 = arith.constant 0.000000e+00 : bf16
    %3 = vector.broadcast %cst_3 : bf16 to vector<8x128xbf16>
    %c0_4 = arith.constant 0 : index
    %c0_5 = arith.constant 0 : index
    %c0_6 = arith.constant 0 : index
    %4 = vector.load %arg3[%c0_4, %c0_5, %c0_6] : memref<16x8x128xbf16, #tpu.memory_space<vmem>>, vector<1x8x128xbf16>
    %5 = vector.shape_cast %4 : vector<1x8x128xbf16> to vector<8x128xbf16>
    %6 = vector.shape_cast %3 : vector<8x128xbf16> to vector<1x8x128xbf16>
    tpu.vector_store %arg3[%c0_4, %c0_5, %c0_6], %6 {strides = array<i32>} : memref<16x8x128xbf16, #tpu.memory_space<vmem>>, vector<1x8x128xbf16>,
    %cst_7 = arith.constant 0.000000e+00 : f32
    %7 = vector.broadcast %cst_7 : f32 to vector<8x128xf32>
    %cst_8 = arith.constant 0.000000e+00 : f32
    %8 = vector.broadcast %cst_8 : f32 to vector<8x128xf32>
    %9 = vector.extract_strided_slice %2 {offsets = [0, 0], sizes = [8, 128], strides = [1, 1]} : vector<8x2048xf32> to vector<8x128xf32>
    %cst_9 = arith.constant 7.500000e-01 : f32
    %10 = vector.broadcast %cst_9 : f32 to vector<8x128xf32>
    %11 = arith.mulf %7, %10 : vector<8x128xf32>
    %12 = arith.addf %11, %9 : vector<8x128xf32>
    %cst_10 = arith.constant 9.687500e-01 : f32
    %13 = vector.broadcast %cst_10 : f32 to vector<8x128xf32>
    %14 = arith.mulf %8, %13 : vector<8x128xf32>
    %15 = arith.addf %14, %12 : vector<8x128xf32>
    %cst_11 = arith.constant 5.120000e+03 : f32
    %16 = vector.broadcast %cst_11 : f32 to vector<8x128xf32>
    %17 = arith.cmpf oge, %15, %16 : vector<8x128xf32>
    %cst_12 = arith.constant 0.000000e+00 : f32
    %18 = vector.broadcast %cst_12 : f32 to vector<8x128xf32>
    %19 = arith.select %17, %18, %15 : vector<8x128xi1>, vector<8x128xf32>
    %20 = arith.extui %17 : vector<8x128xi1> to vector<8x128xi32>
    %21 = arith.sitofp %20 : vector<8x128xi32> to vector<8x128xf32>
    %22 = arith.truncf %21 : vector<8x128xf32> to vector<8x128xbf16>
    %c1 = arith.constant 1 : index
    %c0_13 = arith.constant 0 : index
    %c0_14 = arith.constant 0 : index
    %23 = vector.load %arg3[%c1, %c0_13, %c0_14] : memref<16x8x128xbf16, #tpu.memory_space<vmem>>, vector<1x8x128xbf16>
    %24 = vector.shape_cast %23 : vector<1x8x128xbf16> to vector<8x128xbf16>
    %25 = vector.shape_cast %22 : vector<8x128xbf16> to vector<1x8x128xbf16>
    tpu.vector_store %arg3[%c1, %c0_13, %c0_14], %25 {strides = array<i32>} : memref<16x8x128xbf16, #tpu.memory_space<vmem>>, vector<1x8x128xbf16>,
    %26 = vector.extract_strided_slice %2 {offsets = [0, 128], sizes = [8, 128], strides = [1, 1]} : vector<8x2048xf32> to vector<8x128xf32>
    %cst_15 = arith.constant 7.500000e-01 : f32
    %27 = vector.broadcast %cst_15 : f32 to vector<8x128xf32>
    %28 = arith.mulf %12, %27 : vector<8x128xf32>
    %29 = arith.addf %28, %26 : vector<8x128xf32>
    %cst_16 = arith.constant 9.687500e-01 : f32
    %30 = vector.broadcast %cst_16 : f32 to vector<8x128xf32>
    %31 = arith.mulf %19, %30 : vector<8x128xf32>
    %32 = arith.addf %31, %29 : vector<8x128xf32>
    %cst_17 = arith.constant 5.120000e+03 : f32
    %33 = vector.broadcast %cst_17 : f32 to vector<8x128xf32>
    %34 = arith.cmpf oge, %32, %33 : vector<8x128xf32>
    %cst_18 = arith.constant 0.000000e+00 : f32
    %35 = vector.broadcast %cst_18 : f32 to vector<8x128xf32>
    %36 = arith.select %34, %35, %32 : vector<8x128xi1>, vector<8x128xf32>
    %37 = arith.extui %34 : vector<8x128xi1> to vector<8x128xi32>
    %38 = arith.sitofp %37 : vector<8x128xi32> to vector<8x128xf32>
    %39 = arith.truncf %38 : vector<8x128xf32> to vector<8x128xbf16>
    %c2 = arith.constant 2 : index
    %c0_19 = arith.constant 0 : index
    %c0_20 = arith.constant 0 : index
    %40 = vector.load %arg3[%c2, %c0_19, %c0_20] : memref<16x8x128xbf16, #tpu.memory_space<vmem>>, vector<1x8x128xbf16>
    %41 = vector.shape_cast %40 : vector<1x8x128xbf16> to vector<8x128xbf16>
    %42 = vector.shape_cast %39 : vector<8x128xbf16> to vector<1x8x128xbf16>
    tpu.vector_store %arg3[%c2, %c0_19, %c0_20], %42 {strides = array<i32>} : memref<16x8x128xbf16, #tpu.memory_space<vmem>>, vector<1x8x128xbf16>,
    %43 = vector.extract_strided_slice %2 {offsets = [0, 256], sizes = [8, 128], strides = [1, 1]} : vector<8x2048xf32> to vector<8x128xf32>
    %cst_21 = arith.constant 7.500000e-01 : f32
    %44 = vector.broadcast %cst_21 : f32 to vector<8x128xf32>
    %45 = arith.mulf %29, %44 : vector<8x128xf32>
    %46 = arith.addf %45, %43 : vector<8x128xf32>
    %cst_22 = arith.constant 9.687500e-01 : f32
    %47 = vector.broadcast %cst_22 : f32 to vector<8x128xf32>
    %48 = arith.mulf %36, %47 : vector<8x128xf32>
    %49 = arith.addf %48, %46 : vector<8x128xf32>
    %cst_23 = arith.constant 5.120000e+03 : f32
    %50 = vector.broadcast %cst_23 : f32 to vector<8x128xf32>
    %51 = arith.cmpf oge, %49, %50 : vector<8x128xf32>
    %cst_24 = arith.constant 0.000000e+00 : f32
    %52 = vector.broadcast %cst_24 : f32 to vector<8x128xf32>
    %53 = arith.select %51, %52, %49 : vector<8x128xi1>, vector<8x128xf32>
    %54 = arith.extui %51 : vector<8x128xi1> to vector<8x128xi32>
    %55 = arith.sitofp %54 : vector<8x128xi32> to vector<8x128xf32>
    %56 = arith.truncf %55 : vector<8x128xf32> to vector<8x128xbf16>
    %c3 = arith.constant 3 : index
    %c0_25 = arith.constant 0 : index
    %c0_26 = arith.constant 0 : index
    %57 = vector.load %arg3[%c3, %c0_25, %c0_26] : memref<16x8x128xbf16, #tpu.memory_space<vmem>>, vector<1x8x128xbf16>
    %58 = vector.shape_cast %57 : vector<1x8x128xbf16> to vector<8x128xbf16>
    %59 = vector.shape_cast %56 : vector<8x128xbf16> to vector<1x8x128xbf16>
    tpu.vector_store %arg3[%c3, %c0_25, %c0_26], %59 {strides = array<i32>} : memref<16x8x128xbf16, #tpu.memory_space<vmem>>, vector<1x8x128xbf16>,
    %60 = vector.extract_strided_slice %2 {offsets = [0, 384], sizes = [8, 128], strides = [1, 1]} : vector<8x2048xf32> to vector<8x128xf32>
    %cst_27 = arith.constant 7.500000e-01 : f32
    %61 = vector.broadcast %cst_27 : f32 to vector<8x128xf32>
    %62 = arith.mulf %46, %61 : vector<8x128xf32>
    %63 = arith.addf %62, %60 : vector<8x128xf32>
    %cst_28 = arith.constant 9.687500e-01 : f32
    %64 = vector.broadcast %cst_28 : f32 to vector<8x128xf32>
    %65 = arith.mulf %53, %64 : vector<8x128xf32>
    %66 = arith.addf %65, %63 : vector<8x128xf32>
    %cst_29 = arith.constant 5.120000e+03 : f32
    %67 = vector.broadcast %cst_29 : f32 to vector<8x128xf32>
    %68 = arith.cmpf oge, %66, %67 : vector<8x128xf32>
    %cst_30 = arith.constant 0.000000e+00 : f32
    %69 = vector.broadcast %cst_30 : f32 to vector<8x128xf32>
    %70 = arith.select %68, %69, %66 : vector<8x128xi1>, vector<8x128xf32>
    %71 = arith.extui %68 : vector<8x128xi1> to vector<8x128xi32>
    %72 = arith.sitofp %71 : vector<8x128xi32> to vector<8x128xf32>
    %73 = arith.truncf %72 : vector<8x128xf32> to vector<8x128xbf16>
    %c4 = arith.constant 4 : index
    %c0_31 = arith.constant 0 : index
    %c0_32 = arith.constant 0 : index
    %74 = vector.load %arg3[%c4, %c0_31, %c0_32] : memref<16x8x128xbf16, #tpu.memory_space<vmem>>, vector<1x8x128xbf16>
    %75 = vector.shape_cast %74 : vector<1x8x128xbf16> to vector<8x128xbf16>
    %76 = vector.shape_cast %73 : vector<8x128xbf16> to vector<1x8x128xbf16>
    tpu.vector_store %arg3[%c4, %c0_31, %c0_32], %76 {strides = array<i32>} : memref<16x8x128xbf16, #tpu.memory_space<vmem>>, vector<1x8x128xbf16>,
    %77 = vector.extract_strided_slice %2 {offsets = [0, 512], sizes = [8, 128], strides = [1, 1]} : vector<8x2048xf32> to vector<8x128xf32>
    %cst_33 = arith.constant 7.500000e-01 : f32
    %78 = vector.broadcast %cst_33 : f32 to vector<8x128xf32>
    %79 = arith.mulf %63, %78 : vector<8x128xf32>
    %80 = arith.addf %79, %77 : vector<8x128xf32>
    %cst_34 = arith.constant 9.687500e-01 : f32
    %81 = vector.broadcast %cst_34 : f32 to vector<8x128xf32>
    %82 = arith.mulf %70, %81 : vector<8x128xf32>
    %83 = arith.addf %82, %80 : vector<8x128xf32>
    %cst_35 = arith.constant 5.120000e+03 : f32
    %84 = vector.broadcast %cst_35 : f32 to vector<8x128xf32>
    %85 = arith.cmpf oge, %83, %84 : vector<8x128xf32>
    %cst_36 = arith.constant 0.000000e+00 : f32
    %86 = vector.broadcast %cst_36 : f32 to vector<8x128xf32>
    %87 = arith.select %85, %86, %83 : vector<8x128xi1>, vector<8x128xf32>
    %88 = arith.extui %85 : vector<8x128xi1> to vector<8x128xi32>
    %89 = arith.sitofp %88 : vector<8x128xi32> to vector<8x128xf32>
    %90 = arith.truncf %89 : vector<8x128xf32> to vector<8x128xbf16>
    %c5 = arith.constant 5 : index
    %c0_37 = arith.constant 0 : index
    %c0_38 = arith.constant 0 : index
    %91 = vector.load %arg3[%c5, %c0_37, %c0_38] : memref<16x8x128xbf16, #tpu.memory_space<vmem>>, vector<1x8x128xbf16>
    %92 = vector.shape_cast %91 : vector<1x8x128xbf16> to vector<8x128xbf16>
    %93 = vector.shape_cast %90 : vector<8x128xbf16> to vector<1x8x128xbf16>
    tpu.vector_store %arg3[%c5, %c0_37, %c0_38], %93 {strides = array<i32>} : memref<16x8x128xbf16, #tpu.memory_space<vmem>>, vector<1x8x128xbf16>,
    %94 = vector.extract_strided_slice %2 {offsets = [0, 640], sizes = [8, 128], strides = [1, 1]} : vector<8x2048xf32> to vector<8x128xf32>
    %cst_39 = arith.constant 7.500000e-01 : f32
    %95 = vector.broadcast %cst_39 : f32 to vector<8x128xf32>
    %96 = arith.mulf %80, %95 : vector<8x128xf32>
    %97 = arith.addf %96, %94 : vector<8x128xf32>
    %cst_40 = arith.constant 9.687500e-01 : f32
    %98 = vector.broadcast %cst_40 : f32 to vector<8x128xf32>
    %99 = arith.mulf %87, %98 : vector<8x128xf32>
    %100 = arith.addf %99, %97 : vector<8x128xf32>
    %cst_41 = arith.constant 5.120000e+03 : f32
    %101 = vector.broadcast %cst_41 : f32 to vector<8x128xf32>
    %102 = arith.cmpf oge, %100, %101 : vector<8x128xf32>
    %cst_42 = arith.constant 0.000000e+00 : f32
    %103 = vector.broadcast %cst_42 : f32 to vector<8x128xf32>
    %104 = arith.select %102, %103, %100 : vector<8x128xi1>, vector<8x128xf32>
    %105 = arith.extui %102 : vector<8x128xi1> to vector<8x128xi32>
    %106 = arith.sitofp %105 : vector<8x128xi32> to vector<8x128xf32>
    %107 = arith.truncf %106 : vector<8x128xf32> to vector<8x128xbf16>
    %c6 = arith.constant 6 : index
    %c0_43 = arith.constant 0 : index
    %c0_44 = arith.constant 0 : index
    %108 = vector.load %arg3[%c6, %c0_43, %c0_44] : memref<16x8x128xbf16, #tpu.memory_space<vmem>>, vector<1x8x128xbf16>
    %109 = vector.shape_cast %108 : vector<1x8x128xbf16> to vector<8x128xbf16>
    %110 = vector.shape_cast %107 : vector<8x128xbf16> to vector<1x8x128xbf16>
    tpu.vector_store %arg3[%c6, %c0_43, %c0_44], %110 {strides = array<i32>} : memref<16x8x128xbf16, #tpu.memory_space<vmem>>, vector<1x8x128xbf16>,
    %111 = vector.extract_strided_slice %2 {offsets = [0, 768], sizes = [8, 128], strides = [1, 1]} : vector<8x2048xf32> to vector<8x128xf32>
    %cst_45 = arith.constant 7.500000e-01 : f32
    %112 = vector.broadcast %cst_45 : f32 to vector<8x128xf32>
    %113 = arith.mulf %97, %112 : vector<8x128xf32>
    %114 = arith.addf %113, %111 : vector<8x128xf32>
    %cst_46 = arith.constant 9.687500e-01 : f32
    %115 = vector.broadcast %cst_46 : f32 to vector<8x128xf32>
    %116 = arith.mulf %104, %115 : vector<8x128xf32>
    %117 = arith.addf %116, %114 : vector<8x128xf32>
    %cst_47 = arith.constant 5.120000e+03 : f32
    %118 = vector.broadcast %cst_47 : f32 to vector<8x128xf32>
    %119 = arith.cmpf oge, %117, %118 : vector<8x128xf32>
    %cst_48 = arith.constant 0.000000e+00 : f32
    %120 = vector.broadcast %cst_48 : f32 to vector<8x128xf32>
    %121 = arith.select %119, %120, %117 : vector<8x128xi1>, vector<8x128xf32>
    %122 = arith.extui %119 : vector<8x128xi1> to vector<8x128xi32>
    %123 = arith.sitofp %122 : vector<8x128xi32> to vector<8x128xf32>
    %124 = arith.truncf %123 : vector<8x128xf32> to vector<8x128xbf16>
    %c7 = arith.constant 7 : index
    %c0_49 = arith.constant 0 : index
    %c0_50 = arith.constant 0 : index
    %125 = vector.load %arg3[%c7, %c0_49, %c0_50] : memref<16x8x128xbf16, #tpu.memory_space<vmem>>, vector<1x8x128xbf16>
    %126 = vector.shape_cast %125 : vector<1x8x128xbf16> to vector<8x128xbf16>
    %127 = vector.shape_cast %124 : vector<8x128xbf16> to vector<1x8x128xbf16>
    tpu.vector_store %arg3[%c7, %c0_49, %c0_50], %127 {strides = array<i32>} : memref<16x8x128xbf16, #tpu.memory_space<vmem>>, vector<1x8x128xbf16>,
    %128 = vector.extract_strided_slice %2 {offsets = [0, 896], sizes = [8, 128], strides = [1, 1]} : vector<8x2048xf32> to vector<8x128xf32>
    %cst_51 = arith.constant 7.500000e-01 : f32
    %129 = vector.broadcast %cst_51 : f32 to vector<8x128xf32>
    %130 = arith.mulf %114, %129 : vector<8x128xf32>
    %131 = arith.addf %130, %128 : vector<8x128xf32>
    %cst_52 = arith.constant 9.687500e-01 : f32
    %132 = vector.broadcast %cst_52 : f32 to vector<8x128xf32>
    %133 = arith.mulf %121, %132 : vector<8x128xf32>
    %134 = arith.addf %133, %131 : vector<8x128xf32>
    %cst_53 = arith.constant 5.120000e+03 : f32
    %135 = vector.broadcast %cst_53 : f32 to vector<8x128xf32>
    %136 = arith.cmpf oge, %134, %135 : vector<8x128xf32>
    %cst_54 = arith.constant 0.000000e+00 : f32
    %137 = vector.broadcast %cst_54 : f32 to vector<8x128xf32>
    %138 = arith.select %136, %137, %134 : vector<8x128xi1>, vector<8x128xf32>
    %139 = arith.extui %136 : vector<8x128xi1> to vector<8x128xi32>
    %140 = arith.sitofp %139 : vector<8x128xi32> to vector<8x128xf32>
    %141 = arith.truncf %140 : vector<8x128xf32> to vector<8x128xbf16>
    %c8 = arith.constant 8 : index
    %c0_55 = arith.constant 0 : index
    %c0_56 = arith.constant 0 : index
    %142 = vector.load %arg3[%c8, %c0_55, %c0_56] : memref<16x8x128xbf16, #tpu.memory_space<vmem>>, vector<1x8x128xbf16>
    %143 = vector.shape_cast %142 : vector<1x8x128xbf16> to vector<8x128xbf16>
    %144 = vector.shape_cast %141 : vector<8x128xbf16> to vector<1x8x128xbf16>
    tpu.vector_store %arg3[%c8, %c0_55, %c0_56], %144 {strides = array<i32>} : memref<16x8x128xbf16, #tpu.memory_space<vmem>>, vector<1x8x128xbf16>,
    %145 = vector.extract_strided_slice %2 {offsets = [0, 1024], sizes = [8, 128], strides = [1, 1]} : vector<8x2048xf32> to vector<8x128xf32>
    %cst_57 = arith.constant 7.500000e-01 : f32
    %146 = vector.broadcast %cst_57 : f32 to vector<8x128xf32>
    %147 = arith.mulf %131, %146 : vector<8x128xf32>
    %148 = arith.addf %147, %145 : vector<8x128xf32>
    %cst_58 = arith.constant 9.687500e-01 : f32
    %149 = vector.broadcast %cst_58 : f32 to vector<8x128xf32>
    %150 = arith.mulf %138, %149 : vector<8x128xf32>
    %151 = arith.addf %150, %148 : vector<8x128xf32>
    %cst_59 = arith.constant 5.120000e+03 : f32
    %152 = vector.broadcast %cst_59 : f32 to vector<8x128xf32>
    %153 = arith.cmpf oge, %151, %152 : vector<8x128xf32>
    %cst_60 = arith.constant 0.000000e+00 : f32
    %154 = vector.broadcast %cst_60 : f32 to vector<8x128xf32>
    %155 = arith.select %153, %154, %151 : vector<8x128xi1>, vector<8x128xf32>
    %156 = arith.extui %153 : vector<8x128xi1> to vector<8x128xi32>
    %157 = arith.sitofp %156 : vector<8x128xi32> to vector<8x128xf32>
    %158 = arith.truncf %157 : vector<8x128xf32> to vector<8x128xbf16>
    %c9 = arith.constant 9 : index
    %c0_61 = arith.constant 0 : index
    %c0_62 = arith.constant 0 : index
    %159 = vector.load %arg3[%c9, %c0_61, %c0_62] : memref<16x8x128xbf16, #tpu.memory_space<vmem>>, vector<1x8x128xbf16>
    %160 = vector.shape_cast %159 : vector<1x8x128xbf16> to vector<8x128xbf16>
    %161 = vector.shape_cast %158 : vector<8x128xbf16> to vector<1x8x128xbf16>
    tpu.vector_store %arg3[%c9, %c0_61, %c0_62], %161 {strides = array<i32>} : memref<16x8x128xbf16, #tpu.memory_space<vmem>>, vector<1x8x128xbf16>,
    %162 = vector.extract_strided_slice %2 {offsets = [0, 1152], sizes = [8, 128], strides = [1, 1]} : vector<8x2048xf32> to vector<8x128xf32>
    %cst_63 = arith.constant 7.500000e-01 : f32
    %163 = vector.broadcast %cst_63 : f32 to vector<8x128xf32>
    %164 = arith.mulf %148, %163 : vector<8x128xf32>
    %165 = arith.addf %164, %162 : vector<8x128xf32>
    %cst_64 = arith.constant 9.687500e-01 : f32
    %166 = vector.broadcast %cst_64 : f32 to vector<8x128xf32>
    %167 = arith.mulf %155, %166 : vector<8x128xf32>
    %168 = arith.addf %167, %165 : vector<8x128xf32>
    %cst_65 = arith.constant 5.120000e+03 : f32
    %169 = vector.broadcast %cst_65 : f32 to vector<8x128xf32>
    %170 = arith.cmpf oge, %168, %169 : vector<8x128xf32>
    %cst_66 = arith.constant 0.000000e+00 : f32
    %171 = vector.broadcast %cst_66 : f32 to vector<8x128xf32>
    %172 = arith.select %170, %171, %168 : vector<8x128xi1>, vector<8x128xf32>
    %173 = arith.extui %170 : vector<8x128xi1> to vector<8x128xi32>
    %174 = arith.sitofp %173 : vector<8x128xi32> to vector<8x128xf32>
    %175 = arith.truncf %174 : vector<8x128xf32> to vector<8x128xbf16>
    %c10 = arith.constant 10 : index
    %c0_67 = arith.constant 0 : index
    %c0_68 = arith.constant 0 : index
    %176 = vector.load %arg3[%c10, %c0_67, %c0_68] : memref<16x8x128xbf16, #tpu.memory_space<vmem>>, vector<1x8x128xbf16>
    %177 = vector.shape_cast %176 : vector<1x8x128xbf16> to vector<8x128xbf16>
    %178 = vector.shape_cast %175 : vector<8x128xbf16> to vector<1x8x128xbf16>
    tpu.vector_store %arg3[%c10, %c0_67, %c0_68], %178 {strides = array<i32>} : memref<16x8x128xbf16, #tpu.memory_space<vmem>>, vector<1x8x128xbf16>,
    %179 = vector.extract_strided_slice %2 {offsets = [0, 1280], sizes = [8, 128], strides = [1, 1]} : vector<8x2048xf32> to vector<8x128xf32>
    %cst_69 = arith.constant 7.500000e-01 : f32
    %180 = vector.broadcast %cst_69 : f32 to vector<8x128xf32>
    %181 = arith.mulf %165, %180 : vector<8x128xf32>
    %182 = arith.addf %181, %179 : vector<8x128xf32>
    %cst_70 = arith.constant 9.687500e-01 : f32
    %183 = vector.broadcast %cst_70 : f32 to vector<8x128xf32>
    %184 = arith.mulf %172, %183 : vector<8x128xf32>
    %185 = arith.addf %184, %182 : vector<8x128xf32>
    %cst_71 = arith.constant 5.120000e+03 : f32
    %186 = vector.broadcast %cst_71 : f32 to vector<8x128xf32>
    %187 = arith.cmpf oge, %185, %186 : vector<8x128xf32>
    %cst_72 = arith.constant 0.000000e+00 : f32
    %188 = vector.broadcast %cst_72 : f32 to vector<8x128xf32>
    %189 = arith.select %187, %188, %185 : vector<8x128xi1>, vector<8x128xf32>
    %190 = arith.extui %187 : vector<8x128xi1> to vector<8x128xi32>
    %191 = arith.sitofp %190 : vector<8x128xi32> to vector<8x128xf32>
    %192 = arith.truncf %191 : vector<8x128xf32> to vector<8x128xbf16>
    %c11 = arith.constant 11 : index
    %c0_73 = arith.constant 0 : index
    %c0_74 = arith.constant 0 : index
    %193 = vector.load %arg3[%c11, %c0_73, %c0_74] : memref<16x8x128xbf16, #tpu.memory_space<vmem>>, vector<1x8x128xbf16>
    %194 = vector.shape_cast %193 : vector<1x8x128xbf16> to vector<8x128xbf16>
    %195 = vector.shape_cast %192 : vector<8x128xbf16> to vector<1x8x128xbf16>
    tpu.vector_store %arg3[%c11, %c0_73, %c0_74], %195 {strides = array<i32>} : memref<16x8x128xbf16, #tpu.memory_space<vmem>>, vector<1x8x128xbf16>,
    %196 = vector.extract_strided_slice %2 {offsets = [0, 1408], sizes = [8, 128], strides = [1, 1]} : vector<8x2048xf32> to vector<8x128xf32>
    %cst_75 = arith.constant 7.500000e-01 : f32
    %197 = vector.broadcast %cst_75 : f32 to vector<8x128xf32>
    %198 = arith.mulf %182, %197 : vector<8x128xf32>
    %199 = arith.addf %198, %196 : vector<8x128xf32>
    %cst_76 = arith.constant 9.687500e-01 : f32
    %200 = vector.broadcast %cst_76 : f32 to vector<8x128xf32>
    %201 = arith.mulf %189, %200 : vector<8x128xf32>
    %202 = arith.addf %201, %199 : vector<8x128xf32>
    %cst_77 = arith.constant 5.120000e+03 : f32
    %203 = vector.broadcast %cst_77 : f32 to vector<8x128xf32>
    %204 = arith.cmpf oge, %202, %203 : vector<8x128xf32>
    %cst_78 = arith.constant 0.000000e+00 : f32
    %205 = vector.broadcast %cst_78 : f32 to vector<8x128xf32>
    %206 = arith.select %204, %205, %202 : vector<8x128xi1>, vector<8x128xf32>
    %207 = arith.extui %204 : vector<8x128xi1> to vector<8x128xi32>
    %208 = arith.sitofp %207 : vector<8x128xi32> to vector<8x128xf32>
    %209 = arith.truncf %208 : vector<8x128xf32> to vector<8x128xbf16>
    %c12 = arith.constant 12 : index
    %c0_79 = arith.constant 0 : index
    %c0_80 = arith.constant 0 : index
    %210 = vector.load %arg3[%c12, %c0_79, %c0_80] : memref<16x8x128xbf16, #tpu.memory_space<vmem>>, vector<1x8x128xbf16>
    %211 = vector.shape_cast %210 : vector<1x8x128xbf16> to vector<8x128xbf16>
    %212 = vector.shape_cast %209 : vector<8x128xbf16> to vector<1x8x128xbf16>
    tpu.vector_store %arg3[%c12, %c0_79, %c0_80], %212 {strides = array<i32>} : memref<16x8x128xbf16, #tpu.memory_space<vmem>>, vector<1x8x128xbf16>,
    %213 = vector.extract_strided_slice %2 {offsets = [0, 1536], sizes = [8, 128], strides = [1, 1]} : vector<8x2048xf32> to vector<8x128xf32>
    %cst_81 = arith.constant 7.500000e-01 : f32
    %214 = vector.broadcast %cst_81 : f32 to vector<8x128xf32>
    %215 = arith.mulf %199, %214 : vector<8x128xf32>
    %216 = arith.addf %215, %213 : vector<8x128xf32>
    %cst_82 = arith.constant 9.687500e-01 : f32
    %217 = vector.broadcast %cst_82 : f32 to vector<8x128xf32>
    %218 = arith.mulf %206, %217 : vector<8x128xf32>
    %219 = arith.addf %218, %216 : vector<8x128xf32>
    %cst_83 = arith.constant 5.120000e+03 : f32
    %220 = vector.broadcast %cst_83 : f32 to vector<8x128xf32>
    %221 = arith.cmpf oge, %219, %220 : vector<8x128xf32>
    %cst_84 = arith.constant 0.000000e+00 : f32
    %222 = vector.broadcast %cst_84 : f32 to vector<8x128xf32>
    %223 = arith.select %221, %222, %219 : vector<8x128xi1>, vector<8x128xf32>
    %224 = arith.extui %221 : vector<8x128xi1> to vector<8x128xi32>
    %225 = arith.sitofp %224 : vector<8x128xi32> to vector<8x128xf32>
    %226 = arith.truncf %225 : vector<8x128xf32> to vector<8x128xbf16>
    %c13 = arith.constant 13 : index
    %c0_85 = arith.constant 0 : index
    %c0_86 = arith.constant 0 : index
    %227 = vector.load %arg3[%c13, %c0_85, %c0_86] : memref<16x8x128xbf16, #tpu.memory_space<vmem>>, vector<1x8x128xbf16>
    %228 = vector.shape_cast %227 : vector<1x8x128xbf16> to vector<8x128xbf16>
    %229 = vector.shape_cast %226 : vector<8x128xbf16> to vector<1x8x128xbf16>
    tpu.vector_store %arg3[%c13, %c0_85, %c0_86], %229 {strides = array<i32>} : memref<16x8x128xbf16, #tpu.memory_space<vmem>>, vector<1x8x128xbf16>,
    %230 = vector.extract_strided_slice %2 {offsets = [0, 1664], sizes = [8, 128], strides = [1, 1]} : vector<8x2048xf32> to vector<8x128xf32>
    %cst_87 = arith.constant 7.500000e-01 : f32
    %231 = vector.broadcast %cst_87 : f32 to vector<8x128xf32>
    %232 = arith.mulf %216, %231 : vector<8x128xf32>
    %233 = arith.addf %232, %230 : vector<8x128xf32>
    %cst_88 = arith.constant 9.687500e-01 : f32
    %234 = vector.broadcast %cst_88 : f32 to vector<8x128xf32>
    %235 = arith.mulf %223, %234 : vector<8x128xf32>
    %236 = arith.addf %235, %233 : vector<8x128xf32>
    %cst_89 = arith.constant 5.120000e+03 : f32
    %237 = vector.broadcast %cst_89 : f32 to vector<8x128xf32>
    %238 = arith.cmpf oge, %236, %237 : vector<8x128xf32>
    %cst_90 = arith.constant 0.000000e+00 : f32
    %239 = vector.broadcast %cst_90 : f32 to vector<8x128xf32>
    %240 = arith.select %238, %239, %236 : vector<8x128xi1>, vector<8x128xf32>
    %241 = arith.extui %238 : vector<8x128xi1> to vector<8x128xi32>
    %242 = arith.sitofp %241 : vector<8x128xi32> to vector<8x128xf32>
    %243 = arith.truncf %242 : vector<8x128xf32> to vector<8x128xbf16>
    %c14 = arith.constant 14 : index
    %c0_91 = arith.constant 0 : index
    %c0_92 = arith.constant 0 : index
    %244 = vector.load %arg3[%c14, %c0_91, %c0_92] : memref<16x8x128xbf16, #tpu.memory_space<vmem>>, vector<1x8x128xbf16>
    %245 = vector.shape_cast %244 : vector<1x8x128xbf16> to vector<8x128xbf16>
    %246 = vector.shape_cast %243 : vector<8x128xbf16> to vector<1x8x128xbf16>
    tpu.vector_store %arg3[%c14, %c0_91, %c0_92], %246 {strides = array<i32>} : memref<16x8x128xbf16, #tpu.memory_space<vmem>>, vector<1x8x128xbf16>,
    %247 = vector.extract_strided_slice %2 {offsets = [0, 1792], sizes = [8, 128], strides = [1, 1]} : vector<8x2048xf32> to vector<8x128xf32>
    %cst_93 = arith.constant 7.500000e-01 : f32
    %248 = vector.broadcast %cst_93 : f32 to vector<8x128xf32>
    %249 = arith.mulf %233, %248 : vector<8x128xf32>
    %250 = arith.addf %249, %247 : vector<8x128xf32>
    %cst_94 = arith.constant 9.687500e-01 : f32
    %251 = vector.broadcast %cst_94 : f32 to vector<8x128xf32>
    %252 = arith.mulf %240, %251 : vector<8x128xf32>
    %253 = arith.addf %252, %250 : vector<8x128xf32>
    %cst_95 = arith.constant 5.120000e+03 : f32
    %254 = vector.broadcast %cst_95 : f32 to vector<8x128xf32>
    %255 = arith.cmpf oge, %253, %254 : vector<8x128xf32>
    %256 = arith.extui %255 : vector<8x128xi1> to vector<8x128xi32>
    %257 = arith.sitofp %256 : vector<8x128xi32> to vector<8x128xf32>
    %258 = arith.truncf %257 : vector<8x128xf32> to vector<8x128xbf16>
    %c15 = arith.constant 15 : index
    %c0_96 = arith.constant 0 : index
    %c0_97 = arith.constant 0 : index
    %259 = vector.load %arg3[%c15, %c0_96, %c0_97] : memref<16x8x128xbf16, #tpu.memory_space<vmem>>, vector<1x8x128xbf16>
    %260 = vector.shape_cast %259 : vector<1x8x128xbf16> to vector<8x128xbf16>
    %261 = vector.shape_cast %258 : vector<8x128xbf16> to vector<1x8x128xbf16>
    tpu.vector_store %arg3[%c15, %c0_96, %c0_97], %261 {strides = array<i32>} : memref<16x8x128xbf16, #tpu.memory_space<vmem>>, vector<1x8x128xbf16>,
    return
  }
  func.func @transform_0(%arg0: i32) -> (i32, i32) {
    %c0_i32 = arith.constant 0 : i32
    %c0_i32_0 = arith.constant 0 : i32
    %c0_i32_1 = arith.constant 0 : i32
    return %c0_i32, %c0_i32_0 : i32, i32
  }
  func.func @transform_1(%arg0: i32) -> (i32, i32) {
    %c0_i32 = arith.constant 0 : i32
    %c0_i32_0 = arith.constant 0 : i32
    %c0_i32_1 = arith.constant 0 : i32
    return %c0_i32, %c0_i32_0 : i32, i32
  }
  func.func @transform_2(%arg0: i32) -> (i32, i32, i32) {
    %c0_i32 = arith.constant 0 : i32
    %c0_i32_0 = arith.constant 0 : i32
    %c0_i32_1 = arith.constant 0 : i32
    %c0_i32_2 = arith.constant 0 : i32
    return %c0_i32, %c0_i32_0, %c0_i32_1 : i32, i32, i32
  }
}

</mosaic_0001>

<bundles_post_ra>
// kernel: conv_block_forward.1
= control target key start
LH: loop header
LB: loop body
LE: loop exit
PB: predicated region body
PF: predicated region fallthrough
CT: control target
= control target key end

     0   :  { %vm247_vm0 = vcmask 1041408   ;;  %vm243_vm1 = vcmask 293888   ;;  %s1186_s0 = inlined_call_operand.vmem [shape: bf16[36,2048], index: 0, kind: input, shape index: {}]   ;;  %s1187_s1 = inlined_call_operand.vmem [shape: bf16[8,36], index: 1, kind: input, shape index: {}]   ;;  %s1188_s2 = inlined_call_operand.vmem [shape: bf16[16,8,128], index: 2, kind: output, shape index: {}]  }
   0x1   :  { %v45_v0 = vld [vmem:[%s1186_s0 + $0x100] sm:$0x33]  ;;  %v46_v1 = vld [vmem:[%s1186_s0 + $0x108] sm:$0x33]  ;;  %v47_v31 = vld [vmem:[%s1186_s0 + $0x110] sm:$0x33] }
   0x2   :  { %v153_v2 = vunpack.c.l.b16 %v45_v0  ;;  %v154_v3 = vunpack.c.h.b16 %v45_v0  ;;  %v155_v4 = vunpack.c.l.b16 %v46_v1  ;;  %v156_v5 = vunpack.c.h.b16 %v46_v1  ;;  %v717_v6 = vld [vmem:[%s1186_s0 + $0x80] sm:$0xf]  ;;  %v835_v12 = vld [vmem:[%s1186_s0 + $0x84] sm:$0xf]  ;;  %v725_v14 = vld [vmem:[%s1186_s0 + $0x88] sm:$0xf] }
   0x3   :  { %v842_v7 = vld [vmem:[%s1186_s0 + $0xbc] sm:$0xf0]  ;;  %v719_v13 = vld [vmem:[%s1186_s0 + $0xc0] sm:$0xf0]  ;;  %v843_v15 = vld [vmem:[%s1186_s0 + $0xc4] sm:$0xf0]  ;;  %v157_v36 = vunpack.c.l.b16 %v47_v31  ;;  %v158_v37 = vunpack.c.h.b16 %v47_v31 }
   0x4   :  { %v198_v8 = vpack.c.b16 %v153_v2, %v153_v2  ;;  %v199_v9 = vpack.c.b16 %v154_v3, %v154_v3  ;;  %v200_v10 = vpack.c.b16 %v155_v4, %v155_v4  ;;  %v201_v11 = vpack.c.b16 %v156_v5, %v156_v5  ;;  %v836_v16 = vld [vmem:[%s1186_s0 + $0x8c] sm:$0xf]  ;;  %v657_v22 = vld [vmem:[%s1186_s0] sm:$0xf]  ;;  %v820_v26 = vld [vmem:[%s1186_s0 + $0x4] sm:$0xf] }
   0x5   :  { %v727_v17 = vld [vmem:[%s1186_s0 + $0xc8] sm:$0xf0]  ;;  %v718_v23 = vor.u32 %v842_v7, %v717_v6  ;;  %v722_v24 = vor.u32 %v835_v12, %v719_v13  ;;  %v827_v25 = vld [vmem:[%s1186_s0 + $0x3c] sm:$0xf0]  ;;  %v659_v27 = vld [vmem:[%s1186_s0 + $0x40] sm:$0xf0]  ;;  %v726_v28 = vor.u32 %v843_v15, %v725_v14  ;;  %v202_v42 = vpack.c.b16 %v157_v36, %v157_v36 }
   0x6   :  { %v249_v18 = vsel %vm247_vm0, %v198_v8, 0  ;;  %v252_v19 = vsel %vm247_vm0, %v199_v9, 0  ;;  %v255_v20 = vsel %vm247_vm0, %v200_v10, 0  ;;  %v258_v21 = vsel %vm247_vm0, %v201_v11, 0  ;;  %v665_v30 = vld [vmem:[%s1186_s0 + $0x8] sm:$0xf] }
   0x7   :  { %298 = vmatpush.bf16.msra.mxu0 %v249_v18  ;;  %311 = vmatpush.bf16.msra.mxu1 %v252_v19  ;;  %v730_v29 = vor.u32 %v836_v16, %v727_v17  ;;  %v48_v32 = vld [vmem:[%s1186_s0 + $0x118] sm:$0x33]  ;;  %v828_v33 = vld [vmem:[%s1186_s0 + $0x44] sm:$0xf0]  ;;  %v821_v34 = vld [vmem:[%s1186_s0 + $0xc] sm:$0xf]  ;;  %v658_v40 = vor.u32 %v827_v25, %v657_v22  ;;  %v662_v41 = vor.u32 %v820_v26, %v659_v27 }
   0x8   :  { %324 = vmatpush.bf16.msra.mxu2 %v255_v20  ;;  %337 = vmatpush.bf16.msra.mxu3 %v258_v21  ;;  %v667_v35 = vld [vmem:[%s1186_s0 + $0x48] sm:$0xf0]  ;;  %v159_v38 = vunpack.c.l.b16 %v48_v32  ;;  %v160_v39 = vunpack.c.h.b16 %v48_v32  ;;  %v203_v43 = vpack.c.b16 %v158_v37, %v158_v37  ;;  %v666_v44 = vor.u32 %v828_v33, %v665_v30  ;;  %v733_v47 = vld [vmem:[%s1186_s0 + $0x90] sm:$0xf]  ;;  %v837_v52 = vld [vmem:[%s1186_s0 + $0x94] sm:$0xf] }
   0x9   :  { %v670_v45 = vor.u32 %v821_v34, %v667_v35  ;;  %v844_v48 = vld [vmem:[%s1186_s0 + $0xcc] sm:$0xf0]  ;;  %v261_v50 = vsel %vm247_vm0, %v202_v42, 0  ;;  %v735_v53 = vld [vmem:[%s1186_s0 + $0xd0] sm:$0xf0] }
   0xa   :  { %v204_v46 = vpack.c.b16 %v159_v38, %v159_v38  ;;  %v205_v49 = vpack.c.b16 %v160_v39, %v160_v39  ;;  %v264_v51 = vsel %vm247_vm0, %v203_v43, 0  ;;  %v950_v54 = vld [vmem:[%s1187_s1] sm:$0xf]  ;;  %v50_v56 = vld [vmem:[%s1186_s0 + $0x128] sm:$0x33]  ;;  %v734_v63 = vor.u32 %v844_v48, %v733_v47 }
   0xb   :  { %299 = vmatpush.bf16.msra.mxu0 %v718_v23  ;;  %312 = vmatpush.bf16.msra.mxu1 %v722_v24  ;;  %v49_v55 = vld [vmem:[%s1186_s0 + $0x120] sm:$0x33]  ;;  %v741_v57 = vld [vmem:[%s1186_s0 + $0x98] sm:$0xf]  ;;  %v673_v59 = vld [vmem:[%s1186_s0 + $0x10] sm:$0xf]  ;;  %v738_v0 = vor.u32 %v837_v52, %v735_v53  ;;  %v163_v7 = vunpack.c.l.b16 %v50_v56  ;;  %v164_v8 = vunpack.c.h.b16 %v50_v56 }
   0xc   :  { %325 = vmatpush.bf16.msra.mxu2 %v726_v28  ;;  %338 = vmatpush.bf16.msra.mxu3 %v730_v29  ;;  %v845_v58 = vld [vmem:[%s1186_s0 + $0xd4] sm:$0xf0]  ;;  %v161_v60 = vunpack.c.l.b16 %v49_v55  ;;  %v162_v61 = vunpack.c.h.b16 %v49_v55  ;;  %v267_v62 = vsel %vm247_vm0, %v204_v46, 0  ;;  %v270_v1 = vsel %vm247_vm0, %v205_v49, 0  ;;  %v838_v2 = vld [vmem:[%s1186_s0 + $0x9c] sm:$0xf] }
   0xd   :  { %v743_v3 = vld [vmem:[%s1186_s0 + $0xd8] sm:$0xf0]  ;;  %v829_v4 = vld [vmem:[%s1186_s0 + $0x4c] sm:$0xf0]  ;;  %v822_v5 = vld [vmem:[%s1186_s0 + $0x14] sm:$0xf]  ;;  %v742_v11 = vor.u32 %v845_v58, %v741_v57  ;;  %v208_v19 = vpack.c.b16 %v163_v7, %v163_v7  ;;  %v209_v22 = vpack.c.b16 %v164_v8, %v164_v8 }
   0xe   :  { %v675_v6 = vld [vmem:[%s1186_s0 + $0x50] sm:$0xf0]  ;;  %v206_v9 = vpack.c.b16 %v161_v60, %v161_v60  ;;  %v207_v10 = vpack.c.b16 %v162_v61, %v162_v61  ;;  %v681_v12 = vld [vmem:[%s1186_s0 + $0x18] sm:$0xf]  ;;  %v746_v13 = vor.u32 %v838_v2, %v743_v3  ;;  %v674_v14 = vor.u32 %v829_v4, %v673_v59  ;;  %v823_v17 = vld [vmem:[%s1186_s0 + $0x1c] sm:$0xf] }
   0xf   :  { %300 = vmatpush.bf16.msra.mxu0 %v658_v40  ;;  %313 = vmatpush.bf16.msra.mxu1 %v662_v41  ;;  %v678_v15 = vor.u32 %v822_v5, %v675_v6  ;;  %v830_v16 = vld [vmem:[%s1186_s0 + $0x54] sm:$0xf0]  ;;  %v683_v18 = vld [vmem:[%s1186_s0 + $0x58] sm:$0xf0]  ;;  %v749_v20 = vld [vmem:[%s1186_s0 + $0xa0] sm:$0xf] }
  0x10   :  { %326 = vmatpush.bf16.msra.mxu2 %v666_v44  ;;  %339 = vmatpush.bf16.msra.mxu3 %v670_v45  ;;  %v846_v21 = vld [vmem:[%s1186_s0 + $0xdc] sm:$0xf0]  ;;  %v273_v23 = vsel %vm247_vm0, %v206_v9, 0  ;;  %v276_v24 = vsel %vm247_vm0, %v207_v10, 0  ;;  %v839_v25 = vld [vmem:[%s1186_s0 + $0xa4] sm:$0xf]  ;;  %v682_v27 = vor.u32 %v830_v16, %v681_v12  ;;  %v686_v28 = vor.u32 %v823_v17, %v683_v18 }
  0x11   :  { %v751_v26 = vld [vmem:[%s1186_s0 + $0xe0] sm:$0xf0]  ;;  %v51_v29 = vld [vmem:[%s1186_s0 + $0x130] sm:$0x33]  ;;  %v52_v30 = vld [vmem:[%s1186_s0 + $0x138] sm:$0x3]  ;;  %v750_v34 = vor.u32 %v846_v21, %v749_v20 }
  0x12   :  { %775 = vmatmul.msk.bf16.vlgmr.msra.gmra.mxu0 %vm243_vm1, %v950_v54  ;;  %776 = vmatmul.msk.bf16.vlgmr.msra.gmra.mxu1 %vm243_vm1, %v950_v54  ;;  %v757_v31 = vld [vmem:[%s1186_s0 + $0xa8] sm:$0xf]  ;;  %v279_v33 = vsel %vm247_vm0, %v208_v19, 0  ;;  %v282_v35 = vsel %vm247_vm0, %v209_v22, 0  ;;  %v754_v36 = vor.u32 %v839_v25, %v751_v26  ;;  %v840_v37 = vld [vmem:[%s1186_s0 + $0xac] sm:$0xf]  ;;  %v165_v39 = vunpack.c.l.b16 %v51_v29 }
  0x13   :  { %350 = vmatpush.bf16.msrb.mxu0 %v261_v50  ;;  %363 = vmatpush.bf16.msrb.mxu1 %v264_v51  ;;  %v847_v32 = vld [vmem:[%s1186_s0 + $0xe4] sm:$0xf0]  ;;  %v759_v38 = vld [vmem:[%s1186_s0 + $0xe8] sm:$0xf0]  ;;  %v167_v40 = vunpack.c.l.b16 %v52_v30  ;;  %v689_v41 = vld [vmem:[%s1186_s0 + $0x20] sm:$0xf]  ;;  %v166_v43 = vunpack.c.h.b16 %v51_v29 }
  0x14   :  { %777 = vmatmul.msk.bf16.vlgmr.msra.gmra.mxu2 %vm243_vm1, %v950_v54  ;;  %778 = vmatmul.msk.bf16.vlgmr.msra.gmra.mxu3 %vm243_vm1, %v950_v54  ;;  %v831_v42 = vld [vmem:[%s1186_s0 + $0x5c] sm:$0xf0]  ;;  %v758_v44 = vor.u32 %v847_v32, %v757_v31  ;;  %v697_v45 = vld [vmem:[%s1186_s0 + $0x28] sm:$0xf]  ;;  %v762_v46 = vor.u32 %v840_v37, %v759_v38  ;;  %v824_v47 = vld [vmem:[%s1186_s0 + $0x24] sm:$0xf]  ;;  %v210_v52 = vpack.c.b16 %v165_v39, %v165_v39 }
  0x15   :  { %376 = vmatpush.bf16.msrb.mxu2 %v267_v62  ;;  %389 = vmatpush.bf16.msrb.mxu3 %v270_v1  ;;  %v691_v48 = vld [vmem:[%s1186_s0 + $0x60] sm:$0xf0]  ;;  %v832_v49 = vld [vmem:[%s1186_s0 + $0x64] sm:$0xf0]  ;;  %v825_v50 = vld [vmem:[%s1186_s0 + $0x2c] sm:$0xf]  ;;  %v212_v53 = vpack.c.b16 %v167_v40, %v167_v40  ;;  %v690_v55 = vor.u32 %v831_v42, %v689_v41  ;;  %v211_v57 = vpack.c.b16 %v166_v43, %v166_v43 }
  0x16   :  { %v699_v51 = vld [vmem:[%s1186_s0 + $0x68] sm:$0xf0]  ;;  %v694_v56 = vor.u32 %v824_v47, %v691_v48  ;;  %v698_v58 = vor.u32 %v832_v49, %v697_v45  ;;  %v765_v60 = vld [vmem:[%s1186_s0 + $0xb0] sm:$0xf]  ;;  %v285_v62 = vsel %vm247_vm0, %v210_v52, 0  ;;  %v852_v17 = vmov 0  }
  0x17   :  { %351 = vmatpush.bf16.msrb.mxu0 %v734_v63  ;;  %364 = vmatpush.bf16.msrb.mxu1 %v738_v0  ;;  %v702_v59 = vor.u32 %v825_v50, %v699_v51  ;;  %v848_v61 = vld [vmem:[%s1186_s0 + $0xec] sm:$0xf0]  ;;  %v291_v63 = vsel %vm247_vm0, %v212_v53, 0  ;;  %v773_v0 = vld [vmem:[%s1186_s0 + $0xb8] sm:$0xf]  ;;  %v288_v2 = vsel %vm247_vm0, %v211_v57, 0 }
  0x18   :  { %v849_v1 = vld [vmem:[%s1186_s0 + $0xf4] sm:$0xf0]  ;;  %v841_v3 = vld [vmem:[%s1186_s0 + $0xb4] sm:$0xf]  ;;  %v766_v5 = vor.u32 %v848_v61, %v765_v60  ;;  %v705_v7 = vld [vmem:[%s1186_s0 + $0x30] sm:$0xf] }
  0x19   :  { %377 = vmatpush.bf16.msrb.mxu2 %v742_v11  ;;  %390 = vmatpush.bf16.msrb.mxu3 %v746_v13  ;;  %v767_v4 = vld [vmem:[%s1186_s0 + $0xf0] sm:$0xf0]  ;;  %v774_v6 = vor.u32 %v849_v1, %v773_v0  ;;  %v833_v8 = vld [vmem:[%s1186_s0 + $0x6c] sm:$0xf0]  ;;  %v713_v10 = vld [vmem:[%s1186_s0 + $0x38] sm:$0xf] }
  0x1a   :  { %v770_v9 = vor.u32 %v841_v3, %v767_v4  ;;  %v834_v11 = vld [vmem:[%s1186_s0 + $0x74] sm:$0xf0]  ;;  %v826_v12 = vld [vmem:[%s1186_s0 + $0x34] sm:$0xf]  ;;  %488 = vst [vmem:[%s1188_s2] sm:$0xf] %v852_v17  ;;  %v853_v22 = vmov 0.0  }
  0x1b   :  { %352 = vmatpush.bf16.msrb.mxu0 %v674_v14  ;;  %365 = vmatpush.bf16.msrb.mxu1 %v678_v15  ;;  %v707_v13 = vld [vmem:[%s1186_s0 + $0x70] sm:$0xf0]  ;;  %v706_v14 = vor.u32 %v833_v8, %v705_v7  ;;  %v714_v15 = vor.u32 %v834_v11, %v713_v10 }
  0x1c   :  { %v710_v16 = vor.u32 %v826_v12, %v707_v13 }
  0x1d   :  { %378 = vmatpush.bf16.msrb.mxu2 %v682_v27  ;;  %391 = vmatpush.bf16.msrb.mxu3 %v686_v28 }
  0x1f   :  { %402 = vmatpush.bf16.msra.mxu0 %v273_v23  ;;  %415 = vmatpush.bf16.msra.mxu1 %v276_v24 }
  0x21   :  { %428 = vmatpush.bf16.msra.mxu2 %v279_v33  ;;  %441 = vmatpush.bf16.msra.mxu3 %v282_v35 }
  0x22   :  { %779 = vmatmul.msk.bf16.vlgmr.msrb.gmra.mxu0 %vm243_vm1, %v950_v54  ;;  %780 = vmatmul.msk.bf16.vlgmr.msrb.gmra.mxu1 %vm243_vm1, %v950_v54 }
  0x23   :  { %403 = vmatpush.bf16.msra.mxu0 %v750_v34  ;;  %416 = vmatpush.bf16.msra.mxu1 %v754_v36 }
  0x24   :  { %781 = vmatmul.msk.bf16.vlgmr.msrb.gmra.mxu2 %vm243_vm1, %v950_v54  ;;  %782 = vmatmul.msk.bf16.vlgmr.msrb.gmra.mxu3 %vm243_vm1, %v950_v54 }
  0x25   :  { %429 = vmatpush.bf16.msra.mxu2 %v758_v44  ;;  %442 = vmatpush.bf16.msra.mxu3 %v762_v46 }
  0x27   :  { %404 = vmatpush.bf16.msra.mxu0 %v690_v55  ;;  %417 = vmatpush.bf16.msra.mxu1 %v694_v56 }
  0x29   :  { %430 = vmatpush.bf16.msra.mxu2 %v698_v58  ;;  %443 = vmatpush.bf16.msra.mxu3 %v702_v59 }
  0x2b   :  { %454 = vmatpush.bf16.msrb.mxu0 %v285_v62  ;;  %467 = vmatpush.bf16.msrb.mxu1 %v288_v2 }
  0x2d   :  { %480 = vmatpush.bf16.msrb.mxu2 %v291_v63 }
  0x2f   :  { %455 = vmatpush.bf16.msrb.mxu0 %v766_v5  ;;  %468 = vmatpush.bf16.msrb.mxu1 %v770_v9 }
  0x31   :  { %481 = vmatpush.bf16.msrb.mxu2 %v774_v6 }
  0x32   :  { %783 = vmatmul.msk.bf16.vlgmr.msra.gmra.mxu0 %vm243_vm1, %v950_v54  ;;  %784 = vmatmul.msk.bf16.vlgmr.msra.gmra.mxu1 %vm243_vm1, %v950_v54 }
  0x33   :  { %456 = vmatpush.bf16.msrb.mxu0 %v706_v14  ;;  %469 = vmatpush.bf16.msrb.mxu1 %v710_v16 }
  0x34   :  { %785 = vmatmul.msk.bf16.vlgmr.msra.gmra.mxu2 %vm243_vm1, %v950_v54  ;;  %786 = vmatmul.msk.bf16.vlgmr.msra.gmra.mxu3 %vm243_vm1, %v950_v54 }
  0x35   :  { %482 = vmatpush.bf16.msrb.mxu2 %v714_v15 }
  0x42   :  { %787 = vmatmul.msk.bf16.vlgmr.msrb.gmra.mxu0 %vm243_vm1, %v950_v54  ;;  %788 = vmatmul.msk.bf16.vlgmr.msrb.gmra.mxu1 %vm243_vm1, %v950_v54 }
  0x44   :  { %789 = vmatmul.msk.bf16.vlgmr.msrb.gmra.mxu2 %vm243_vm1, %v950_v54 }
  0x8f   :  { %v302_v18 = vpop.f32.mrf.mxu0  ;;  %v315_v19 = vpop.f32.mrf.mxu1 }
  0x90   :  { %vm491_vm2 = vcmp.ge.f32.partialorder %v302_v18, 5120.0  ;;  %v498_v20 = vmul.f32 0.75, %v302_v18 }
  0x91   :  { %v492_v21 = vsel %vm491_vm2, 0.0, %v302_v18  ;;  %v790_v23 = vsel %vm491_vm2, 1.0, %v853_v22 }
  0x92   :  { %v495_v24 = vpack.c.bf16 %v790_v23, %v790_v23  ;;  %v500_v25 = vmul.f32 0.96875, %v492_v21  ;;  %v499_v26 = vadd.f32 %v498_v20, %v315_v19 }
  0x94   :  { %791 = vst [vmem:[%s1188_s2 + $0x4] sm:$0xf] %v495_v24  ;;  %v501_v54 = vadd.f32 %v500_v25, %v499_v26  ;;  %v509_v27 = vmul.f32 0.75, %v499_v26 }
  0x96   :  { %vm502_vm3 = vcmp.ge.f32.partialorder %v501_v54, 5120.0 }
  0x97   :  { %v328_v28 = vpop.f32.mrf.mxu2  ;;  %v341_v29 = vpop.f32.mrf.mxu3  ;;  %v503_v30 = vsel %vm502_vm3, 0.0, %v501_v54  ;;  %v792_v31 = vsel %vm502_vm3, 1.0, %v853_v22 }
  0x98   :  { %v510_v32 = vadd.f32 %v509_v27, %v328_v28  ;;  %v304_v33 = vpop.f32.mrf.mxu0  ;;  %v317_v34 = vpop.f32.mrf.mxu1  ;;  %v506_v35 = vpack.c.bf16 %v792_v31, %v792_v31  ;;  %v511_v36 = vmul.f32 0.96875, %v503_v30 }
  0x9a   :  { %v520_v37 = vmul.f32 0.75, %v510_v32  ;;  %793 = vst [vmem:[%s1188_s2 + $0x8] sm:$0xf] %v506_v35  ;;  %v512_v38 = vadd.f32 %v511_v36, %v510_v32 }
  0x9c   :  { %v521_v39 = vadd.f32 %v520_v37, %v341_v29  ;;  %vm513_vm4 = vcmp.ge.f32.partialorder %v512_v38, 5120.0 }
  0x9d   :  { %v514_v40 = vsel %vm513_vm4, 0.0, %v512_v38  ;;  %v794_v41 = vsel %vm513_vm4, 1.0, %v853_v22 }
  0x9e   :  { %v517_v42 = vpack.c.bf16 %v794_v41, %v794_v41  ;;  %v522_v43 = vmul.f32 0.96875, %v514_v40  ;;  %v531_v46 = vmul.f32 0.75, %v521_v39 }
  0x9f   :  { %v330_v44 = vpop.f32.mrf.mxu2  ;;  %v343_v45 = vpop.f32.mrf.mxu3 }
  0xa0   :  { %v354_v47 = vpop.f32.mrf.mxu0  ;;  %v367_v48 = vpop.f32.mrf.mxu1  ;;  %795 = vst [vmem:[%s1188_s2 + $0xc] sm:$0xf] %v517_v42  ;;  %v523_v49 = vadd.f32 %v522_v43, %v521_v39 }
  0xa1   :  { %v532_v50 = vadd.f32 %v531_v46, %v354_v47 }
  0xa2   :  { %vm524_vm5 = vcmp.ge.f32.partialorder %v523_v49, 5120.0 }
  0xa3   :  { %v542_v51 = vmul.f32 0.75, %v532_v50  ;;  %v525_v52 = vsel %vm524_vm5, 0.0, %v523_v49  ;;  %v796_v53 = vsel %vm524_vm5, 1.0, %v853_v22 }
  0xa4   :  { %v528_v55 = vpack.c.bf16 %v796_v53, %v796_v53  ;;  %v533_v56 = vmul.f32 0.96875, %v525_v52 }
  0xa5   :  { %v543_v57 = vadd.f32 %v542_v51, %v367_v48 }
  0xa6   :  { %797 = vst [vmem:[%s1188_s2 + $0x10] sm:$0xf] %v528_v55  ;;  %v534_v58 = vadd.f32 %v533_v56, %v532_v50 }
  0xa7   :  { %v380_v59 = vpop.f32.mrf.mxu2  ;;  %v553_v60 = vmul.f32 0.75, %v543_v57  ;;  %v393_v61 = vpop.f32.mrf.mxu3 }
  0xa8   :  { %v356_v62 = vpop.f32.mrf.mxu0  ;;  %v369_v63 = vpop.f32.mrf.mxu1  ;;  %vm535_vm6 = vcmp.ge.f32.partialorder %v534_v58, 5120.0 }
  0xa9   :  { %v554_v0 = vadd.f32 %v553_v60, %v380_v59  ;;  %v536_v1 = vsel %vm535_vm6, 0.0, %v534_v58  ;;  %v798_v2 = vsel %vm535_vm6, 1.0, %v853_v22 }
  0xaa   :  { %v539_v3 = vpack.c.bf16 %v798_v2, %v798_v2  ;;  %v544_v4 = vmul.f32 0.96875, %v536_v1 }
  0xab   :  { %v564_v5 = vmul.f32 0.75, %v554_v0 }
  0xac   :  { %799 = vst [vmem:[%s1188_s2 + $0x14] sm:$0xf] %v539_v3  ;;  %v545_v6 = vadd.f32 %v544_v4, %v543_v57 }
  0xad   :  { %v565_v7 = vadd.f32 %v564_v5, %v393_v61 }
  0xae   :  { %vm546_vm7 = vcmp.ge.f32.partialorder %v545_v6, 5120.0 }
  0xaf   :  { %v382_v8 = vpop.f32.mrf.mxu2  ;;  %v575_v9 = vmul.f32 0.75, %v565_v7  ;;  %v395_v10 = vpop.f32.mrf.mxu3  ;;  %v547_v11 = vsel %vm546_vm7, 0.0, %v545_v6  ;;  %v800_v12 = vsel %vm546_vm7, 1.0, %v853_v22 }
  0xb0   :  { %v406_v13 = vpop.f32.mrf.mxu0  ;;  %v419_v14 = vpop.f32.mrf.mxu1  ;;  %v550_v15 = vpack.c.bf16 %v800_v12, %v800_v12  ;;  %v555_v16 = vmul.f32 0.96875, %v547_v11 }
  0xb1   :  { %v576_v17 = vadd.f32 %v575_v9, %v406_v13 }
  0xb2   :  { %801 = vst [vmem:[%s1188_s2 + $0x18] sm:$0xf] %v550_v15  ;;  %v556_v18 = vadd.f32 %v555_v16, %v554_v0 }
  0xb3   :  { %v586_v19 = vmul.f32 0.75, %v576_v17 }
  0xb4   :  { %vm557_vm8 = vcmp.ge.f32.partialorder %v556_v18, 5120.0 }
  0xb5   :  { %v558_v20 = vsel %vm557_vm8, 0.0, %v556_v18  ;;  %v802_v21 = vsel %vm557_vm8, 1.0, %v853_v22  ;;  %v587_v29 = vadd.f32 %v586_v19, %v419_v14 }
  0xb6   :  { %v561_v23 = vpack.c.bf16 %v802_v21, %v802_v21  ;;  %v566_v24 = vmul.f32 0.96875, %v558_v20 }
  0xb7   :  { %v432_v25 = vpop.f32.mrf.mxu2  ;;  %v445_v26 = vpop.f32.mrf.mxu3  ;;  %v597_v34 = vmul.f32 0.75, %v587_v29 }
  0xb8   :  { %v408_v54 = vpop.f32.mrf.mxu0  ;;  %v421_v27 = vpop.f32.mrf.mxu1  ;;  %803 = vst [vmem:[%s1188_s2 + $0x1c] sm:$0xf] %v561_v23  ;;  %v567_v28 = vadd.f32 %v566_v24, %v565_v7 }
  0xb9   :  { %v598_v40 = vadd.f32 %v597_v34, %v432_v25 }
  0xba   :  { %vm568_vm9 = vcmp.ge.f32.partialorder %v567_v28, 5120.0 }
  0xbb   :  { %v569_v30 = vsel %vm568_vm9, 0.0, %v567_v28  ;;  %v804_v31 = vsel %vm568_vm9, 1.0, %v853_v22  ;;  %v608_v46 = vmul.f32 0.75, %v598_v40 }
  0xbc   :  { %v572_v32 = vpack.c.bf16 %v804_v31, %v804_v31  ;;  %v577_v33 = vmul.f32 0.96875, %v569_v30 }
  0xbd   :  { %v609_v55 = vadd.f32 %v608_v46, %v445_v26 }
  0xbe   :  { %805 = vst [vmem:[%s1188_s2 + $0x20] sm:$0xf] %v572_v32  ;;  %v578_v35 = vadd.f32 %v577_v33, %v576_v17 }
  0xbf   :  { %v434_v36 = vpop.f32.mrf.mxu2  ;;  %v447_v37 = vpop.f32.mrf.mxu3  ;;  %v619_v57 = vmul.f32 0.75, %v609_v55 }
  0xc0   :  { %v458_v38 = vpop.f32.mrf.mxu0  ;;  %v471_v39 = vpop.f32.mrf.mxu1  ;;  %vm579_vm10 = vcmp.ge.f32.partialorder %v578_v35, 5120.0 }
  0xc1   :  { %v580_v41 = vsel %vm579_vm10, 0.0, %v578_v35  ;;  %v806_v42 = vsel %vm579_vm10, 1.0, %v853_v22  ;;  %v620_v0 = vadd.f32 %v619_v57, %v458_v38 }
  0xc2   :  { %v583_v43 = vpack.c.bf16 %v806_v42, %v806_v42  ;;  %v588_v44 = vmul.f32 0.96875, %v580_v41 }
  0xc3   :  { %v630_v5 = vmul.f32 0.75, %v620_v0 }
  0xc4   :  { %807 = vst [vmem:[%s1188_s2 + $0x24] sm:$0xf] %v583_v43  ;;  %v589_v45 = vadd.f32 %v588_v44, %v587_v29 }
  0xc5   :  { %v631_v7 = vadd.f32 %v630_v5, %v471_v39 }
  0xc6   :  { %vm590_vm11 = vcmp.ge.f32.partialorder %v589_v45, 5120.0 }
  0xc7   :  { %v484_v47 = vpop.f32.mrf.mxu2  ;;  %v591_v48 = vsel %vm590_vm11, 0.0, %v589_v45  ;;  %v808_v49 = vsel %vm590_vm11, 1.0, %v853_v22  ;;  %v641_v13 = vmul.f32 0.75, %v631_v7 }
  0xc8   :  { %v460_v50 = vpop.f32.mrf.mxu0  ;;  %v473_v51 = vpop.f32.mrf.mxu1  ;;  %v594_v52 = vpack.c.bf16 %v808_v49, %v808_v49  ;;  %v599_v53 = vmul.f32 0.96875, %v591_v48 }
  0xc9   :  { %v642_v17 = vadd.f32 %v641_v13, %v484_v47 }
  0xca   :  { %809 = vst [vmem:[%s1188_s2 + $0x28] sm:$0xf] %v594_v52  ;;  %v600_v56 = vadd.f32 %v599_v53, %v598_v40 }
  0xcc   :  { %vm601_vm12 = vcmp.ge.f32.partialorder %v600_v56, 5120.0 }
  0xcd   :  { %v602_v58 = vsel %vm601_vm12, 0.0, %v600_v56  ;;  %v810_v59 = vsel %vm601_vm12, 1.0, %v853_v22 }
  0xce   :  { %v605_v60 = vpack.c.bf16 %v810_v59, %v810_v59  ;;  %v610_v61 = vmul.f32 0.96875, %v602_v58 }
  0xcf   :  { %v486_v62 = vpop.f32.mrf.mxu2 }
  0xd0   :  { %811 = vst [vmem:[%s1188_s2 + $0x2c] sm:$0xf] %v605_v60  ;;  %v611_v63 = vadd.f32 %v610_v61, %v609_v55 }
  0xd2   :  { %vm612_vm13 = vcmp.ge.f32.partialorder %v611_v63, 5120.0 }
  0xd3   :  { %v613_v1 = vsel %vm612_vm13, 0.0, %v611_v63  ;;  %v812_v2 = vsel %vm612_vm13, 1.0, %v853_v22 }
  0xd4   :  { %v616_v3 = vpack.c.bf16 %v812_v2, %v812_v2  ;;  %v621_v4 = vmul.f32 0.96875, %v613_v1 }
  0xd6   :  { %813 = vst [vmem:[%s1188_s2 + $0x30] sm:$0xf] %v616_v3  ;;  %v622_v6 = vadd.f32 %v621_v4, %v620_v0 }
  0xd8   :  { %vm623_vm14 = vcmp.ge.f32.partialorder %v622_v6, 5120.0 }
  0xd9   :  { %v624_v8 = vsel %vm623_vm14, 0.0, %v622_v6  ;;  %v814_v9 = vsel %vm623_vm14, 1.0, %v853_v22 }
  0xda   :  { %v627_v10 = vpack.c.bf16 %v814_v9, %v814_v9  ;;  %v632_v11 = vmul.f32 0.96875, %v624_v8 }
  0xdc   :  { %815 = vst [vmem:[%s1188_s2 + $0x34] sm:$0xf] %v627_v10  ;;  %v633_v12 = vadd.f32 %v632_v11, %v631_v7 }
  0xde   :  { %vm634_vm15 = vcmp.ge.f32.partialorder %v633_v12, 5120.0 }
  0xdf   :  { %v635_v14 = vsel %vm634_vm15, 0.0, %v633_v12  ;;  %v816_v15 = vsel %vm634_vm15, 1.0, %v853_v22 }
  0xe0   :  { %v638_v16 = vpack.c.bf16 %v816_v15, %v816_v15  ;;  %v643_v18 = vmul.f32 0.96875, %v635_v14 }
  0xe2   :  { %817 = vst [vmem:[%s1188_s2 + $0x38] sm:$0xf] %v638_v16  ;;  %v644_v19 = vadd.f32 %v643_v18, %v642_v17 }
  0xe4   :  { %vm645_vm0 = vcmp.ge.f32.partialorder %v644_v19, 5120.0 }
  0xe5   :  { %v818_v20 = vsel %vm645_vm0, 1.0, %v853_v22 }
  0xe6   :  { %v648_v21 = vpack.c.bf16 %v818_v20, %v818_v20 }
  0xe8   :  { %819 = vst [vmem:[%s1188_s2 + $0x3c] sm:$0xf] %v648_v21 }

</bundles_post_ra>
